<compile_context>
chip_gen: v7x
topology: tpu7x:2x2x1
jax: 0.10.0
libtpu: 0.0.40
codegen_flags: <defaults>
</compile_context>

<pallas_src>
import functools

import jax
import jax.numpy as jnp
from jax import lax
from jax.experimental import pallas as pl
from jax.experimental.pallas import tpu as pltpu

_LANES = 128


def _round_up(x, m):
    return ((x + m - 1) // m) * m


def _pick_batch_tile(B, T):
    """Pick TB so TB*T is ~1024 rows (amortize per-step grid overhead, useful
    MXU M), keep >= 2 blocks when the batch allows it (v7x megacore shards the
    batch grid across TensorCores), keep TB 8-aligned."""
    if B <= 8 or B % 8 != 0:
        return B
    target = _round_up(max(8, -(-1024 // T)), 8)
    divs = [d for d in range(8, B, 8) if B % d == 0]   # 8-aligned, >= 2 blocks
    if not divs:
        return B
    under = [d for d in divs if d <= target]
    return max(under) if under else min(divs)


def _emotion_classifier_kernel(*refs, frames_per_sample, num_classes,
                               compute_loss, use_pool, mxu_dtype):
    it = iter(refs)
    frames_ref = next(it)
    w1_ref = next(it)
    b1_ref = next(it)
    wc_ref = next(it)
    bc_ref = next(it)
    pool_ref = next(it) if use_pool else None
    labels_ref = next(it) if compute_loss else None
    logits_ref = next(it)
    loss_ref = next(it) if compute_loss else None

    T = frames_per_sample

    # ---- backbone: per-frame linear + tanh (MXU matmul, f32 accumulation) ----
    # frames arrive in f32; cast to the MXU dtype on the VPU (slack slot).
    frames = frames_ref[...].astype(mxu_dtype)                     # (TB*T, fs)
    h = jnp.dot(frames, w1_ref[...],
                preferred_element_type=jnp.float32)                # (TB*T, HP)
    h = jnp.tanh(h + b1_ref[...])                                  # padded cols stay 0

    # ---- mean-pool over frames ----------------------------------------------
    if use_pool:
        # Ragged-T fallback: block-diagonal pooling matmul in mxu_dtype.
        feat = jnp.dot(pool_ref[...], h.astype(pool_ref.dtype),
                       preferred_element_type=jnp.float32)         # (TB, HP)
    else:
        # T % 8 == 0: pure re-tiling reshape + sublane-group reduce (XLU slot),
        # no quadratic pool operand, exact f32 accumulation.
        tb = h.shape[0] // T
        feat = jnp.sum(h.reshape(tb, T, h.shape[-1]), axis=1) * (1.0 / T)

    # ---- classifier head (lane-dense, N padded to 128) -----------------------
    logits = jnp.dot(feat.astype(mxu_dtype), wc_ref[...],
                     preferred_element_type=jnp.float32) + bc_ref[...]  # (TB, CP)
    logits_ref[...] = logits.astype(logits_ref.dtype)

    if compute_loss:
        # Cross-entropy over the first `num_classes` lanes only.
        # NOTE: labels are assumed to lie in [0, num_classes) (same contract as
        # torch.nn.CrossEntropyLoss); out-of-range labels are undefined.
        cls = lax.broadcasted_iota(jnp.int32, logits.shape, 1)     # (TB, CP)
        valid = cls < num_classes
        masked = jnp.where(valid, logits, jnp.float32(-1e30))
        m = jnp.max(masked, axis=-1, keepdims=True)
        z = masked - m
        sumexp = jnp.sum(jnp.exp(z), axis=-1, keepdims=True)       # padded -> exp(-huge)=0
        lab = labels_ref[...]                                      # (TB, 1) int32
        z_at_label = jnp.sum(jnp.where(cls == lab, z, 0.0),
                             axis=-1, keepdims=True)
        nll = jnp.log(sumexp) - z_at_label                         # (TB, 1)
        # Per-block partial sum, broadcast into a lane-dense (1, 1, 128) block.
        loss_ref[...] = jnp.zeros(loss_ref.shape, jnp.float32) + jnp.sum(nll)


def init_params(key, frame_size=16, hidden=32, num_classes=8):
    k1, k2, k3, k4 = jax.random.split(key, 4)
    scale1 = 1.0 / jnp.sqrt(frame_size)
    scale2 = 1.0 / jnp.sqrt(hidden)
    return {
        "w1": jax.random.normal(k1, (frame_size, hidden), jnp.float32) * scale1,
        "b1": jax.random.normal(k2, (1, hidden), jnp.float32) * 0.01,
        "wc": jax.random.normal(k3, (hidden, num_classes), jnp.float32) * scale2,
        "bc": jax.random.normal(k4, (1, num_classes), jnp.float32) * 0.01,
    }


def prepare_params(params, *, frame_size=16, hidden=32, num_classes=8,
                   mxu_dtype=jnp.bfloat16):
    """One-time prep: zero-pad weights/biases out to lane-dense (..., 128)
    slabs and cast MXU operands.  Hoisted out of the per-call forward path."""
    HP = _round_up(max(hidden, _LANES), _LANES)
    CP = _round_up(max(num_classes, _LANES), _LANES)
    w1p = jnp.zeros((frame_size, HP), mxu_dtype).at[:, :hidden].set(
        params["w1"].astype(mxu_dtype))
    b1p = jnp.zeros((1, HP), jnp.float32).at[:, :hidden].set(
        params["b1"].reshape(1, hidden).astype(jnp.float32))
    wcp = jnp.zeros((HP, CP), mxu_dtype).at[:hidden, :num_classes].set(
        params["wc"].astype(mxu_dtype))
    bcp = jnp.zeros((1, CP), jnp.float32).at[:, :num_classes].set(
        params["bc"].reshape(1, num_classes).astype(jnp.float32))
    return {"w1p": w1p, "b1p": b1p, "wcp": wcp, "bcp": bcp,
            "frame_size": frame_size, "hidden": hidden,
            "num_classes": num_classes, "mxu_dtype": mxu_dtype,
            "HP": HP, "CP": CP}


def emotion_classifier_forward(audio, prep, label=None, *, batch_tile=None):
    """audio: (batch, seq_len) f32 ; label: optional (batch,) int32.
    `prep` is the dict returned by prepare_params."""
    frame_size = prep["frame_size"]
    num_classes = prep["num_classes"]
    mxu_dtype = prep["mxu_dtype"]
    HP, CP = prep["HP"], prep["CP"]

    B, S = audio.shape
    # Trailing samples (S % frame_size) are silently dropped, matching the
    # reference framing.
    T = S // frame_size
    assert T >= 1, "seq_len must be at least one frame"

    if batch_tile is None:
        batch_tile = _pick_batch_tile(B, T)
    TB = batch_tile
    assert B % TB == 0, "batch must divide evenly into the batch tile"
    num_blocks = B // TB

    # Frame the waveform row-major: row b*T + t holds frame t of sample b.
    # Kept in f32; the cast to the MXU dtype happens inside the kernel.
    frames = audio[:, : T * frame_size].reshape(B * T, frame_size)

    use_pool = (T % 8) != 0
    compute_loss = label is not None
    # bf16 writeback only when the (TB, CP) store is (16, 128)-tile aligned.
    narrow_out = (jnp.dtype(mxu_dtype).itemsize < 4) and (TB % 16 == 0)
    logits_dtype = mxu_dtype if narrow_out else jnp.float32

    in_specs = [
        pl.BlockSpec((TB * T, frame_size), lambda i: (i, 0)),
        pl.BlockSpec((frame_size, HP), lambda i: (0, 0)),
        pl.BlockSpec((1, HP), lambda i: (0, 0)),
        pl.BlockSpec((HP, CP), lambda i: (0, 0)),
        pl.BlockSpec((1, CP), lambda i: (0, 0)),
    ]
    inputs = [frames, prep["w1p"], prep["b1p"], prep["wcp"], prep["bcp"]]

    if use_pool:
        # Ragged-T fallback only: block-local mean-pool selector
        # pool[r, r*T + t] = 1/T (identical for every batch block).
        pool = (jnp.repeat(jnp.eye(TB, dtype=jnp.float32), T, axis=1) / T
                ).astype(mxu_dtype)
        in_specs.append(pl.BlockSpec((TB, TB * T), lambda i: (0, 0)))
        inputs.append(pool)
    if compute_loss:
        in_specs.append(pl.BlockSpec((TB, 1), lambda i: (i, 0)))
        inputs.append(jnp.asarray(label, jnp.int32).reshape(B, 1))

    out_shape = [jax.ShapeDtypeStruct((B, CP), logits_dtype)]
    out_specs = [pl.BlockSpec((TB, CP), lambda i: (i, 0))]
    if compute_loss:
        out_shape.append(jax.ShapeDtypeStruct((num_blocks, 1, CP), jnp.float32))
        out_specs.append(pl.BlockSpec((1, 1, CP), lambda i: (i, 0, 0)))

    kernel = functools.partial(
        _emotion_classifier_kernel, frames_per_sample=T,
        num_classes=num_classes, compute_loss=compute_loss,
        use_pool=use_pool, mxu_dtype=mxu_dtype)

    outs = pl.pallas_call(
        kernel,
        out_shape=tuple(out_shape),
        grid=(num_blocks,),
        in_specs=in_specs,
        out_specs=tuple(out_specs),
        compiler_params=pltpu.CompilerParams(
            # Per-block footprint ~= 2x(TB*T, fs) f32 frames + (TB*T, 128) f32
            # h temp + small weight slabs: well under v7x's 64 MiB at any
            # realistic tile; 32 MiB scoped cap leaves headroom.
            dimension_semantics=("parallel",),
            vmem_limit_bytes=32 * 1024 * 1024),
    )(*inputs)

    if compute_loss:
        logits_pad, loss_partial = outs
    else:
        (logits_pad,) = outs

    results = {"logits": logits_pad[:, :num_classes].astype(jnp.float32)}
    if compute_loss:
        results["loss"] = jnp.sum(loss_partial[:, 0, 0]) / B
    return results


def _reference_forward(audio, params, label, frame_size=16):
    B, S = audio.shape
    T = S // frame_size
    frames = audio[:, : T * frame_size].reshape(B, T, frame_size)
    h = jnp.tanh(frames @ params["w1"] + params["b1"])
    feat = jnp.mean(h, axis=1)
    logits = feat @ params["wc"] + params["bc"]
    logp = jax.nn.log_softmax(logits, axis=-1)
    loss = -jnp.mean(jnp.take_along_axis(logp, label[:, None], axis=-1))
    return logits, loss


if __name__ == "__main__":
    key = jax.random.PRNGKey(0)
    k_audio, k_label, k_params, k_audio2, k_label2, k_audio3 = jax.random.split(key, 6)

    frame_size, hidden, num_classes = 16, 32, 8

    params = init_params(k_params, frame_size=frame_size, hidden=hidden,
                         num_classes=num_classes)
    # One-time weight prep (padding / casting hoisted out of the forward path).
    prep_f32 = prepare_params(params, frame_size=frame_size, hidden=hidden,
                              num_classes=num_classes, mxu_dtype=jnp.float32)
    prep_bf16 = prepare_params(params, frame_size=frame_size, hidden=hidden,
                               num_classes=num_classes, mxu_dtype=jnp.bfloat16)

    # --- 1) small batch (B=16, T=8): f32 exact-check mode vs pure-JAX reference ---
    batch, seq_len = 16, 128
    audio = jax.random.normal(k_audio, (batch, seq_len), jnp.float32)
    label = jax.random.randint(k_label, (batch,), 0, num_classes, jnp.int32)
    ref_logits, ref_loss = _reference_forward(audio, params, label, frame_size)

    out_f32 = emotion_classifier_forward(audio, prep_f32, label)
    jax.block_until_ready(out_f32)
    assert jnp.allclose(out_f32["logits"], ref_logits, atol=1e-4, rtol=1e-4)
    assert jnp.allclose(out_f32["loss"], ref_loss, atol=1e-4, rtol=1e-4)

    # --- 2) bf16 MXU fast path (ship on v5e/v6e/v7x), f32 accumulation ---
    out_bf16 = emotion_classifier_forward(audio, prep_bf16, label)
    jax.block_until_ready(out_bf16)
    assert jnp.allclose(out_bf16["logits"], ref_logits, atol=5e-2, rtol=5e-2)
    assert jnp.allclose(out_bf16["loss"], ref_loss, atol=5e-2, rtol=5e-2)

    # --- 3) inference path: loss branch / label input statically compiled out ---
    out_inf = emotion_classifier_forward(audio, prep_bf16, None)
    jax.block_until_ready(out_inf)
    assert "loss" not in out_inf
    assert jnp.allclose(out_inf["logits"], out_bf16["logits"], atol=1e-4, rtol=1e-4)

    # --- 4) larger batch: bigger batch tile (TB=32, 2 blocks for v7x megacore)
    #        and the bf16 logits writeback path (TB % 16 == 0) ---
    batch2 = 64
    audio2 = jax.random.normal(k_audio2, (batch2, seq_len), jnp.float32)
    label2 = jax.random.randint(k_label2, (batch2,), 0, num_classes, jnp.int32)
    ref2_logits, ref2_loss = _reference_forward(audio2, params, label2, frame_size)
    out2 = emotion_classifier_forward(audio2, prep_bf16, label2)
    jax.block_until_ready(out2)
    assert jnp.allclose(out2["logits"], ref2_logits, atol=5e-2, rtol=5e-2)
    assert jnp.allclose(out2["loss"], ref2_loss, atol=5e-2, rtol=5e-2)

    # --- 5) ragged frame count (seq=80 -> T=5): pooling-matmul fallback path ---
    seq_len3 = 80
    audio3 = jax.random.normal(k_audio3, (batch, seq_len3), jnp.float32)
    ref3_logits, ref3_loss = _reference_forward(audio3, params, label, frame_size)
    out3 = emotion_classifier_forward(audio3, prep_f32, label)
    jax.block_until_ready(out3)
    assert jnp.allclose(out3["logits"], ref3_logits, atol=1e-4, rtol=1e-4)
    assert jnp.allclose(out3["loss"], ref3_loss, atol=1e-4, rtol=1e-4)

    print("KERNEL_OK")
</pallas_src>

<mosaic_0001>
module attributes {stable_mosaic.version = 11 : i64} {
  func.func @_emotion_classifier_kernel(%arg0: i32, %arg1: memref<64x16xf32, #tpu.memory_space<vmem>>, %arg2: memref<16x128xf32, #tpu.memory_space<vmem>>, %arg3: memref<1x128xf32, #tpu.memory_space<vmem>>, %arg4: memref<128x128xf32, #tpu.memory_space<vmem>>, %arg5: memref<1x128xf32, #tpu.memory_space<vmem>>, %arg6: memref<8x1xi32, #tpu.memory_space<vmem>>, %arg7: memref<8x128xf32, #tpu.memory_space<vmem>>, %arg8: memref<1x1x128xf32, #tpu.memory_space<vmem>>) attributes {dimension_semantics = [#tpu.dimension_semantics<parallel>], iteration_bounds = array<i64: 2>, scalar_prefetch = 0 : i64, scratch_operands = 0 : i64, tpu.core_type = #tpu.core_type<tc>, window_params = [{transform_indices = @transform_0, window_bounds = array<i64: 64, 16>}, {pipeline_mode = #tpu.pipeline_mode<synchronous>, transform_indices = @transform_1, window_bounds = array<i64: 16, 128>}, {pipeline_mode = #tpu.pipeline_mode<synchronous>, transform_indices = @transform_2, window_bounds = array<i64: 1, 128>}, {pipeline_mode = #tpu.pipeline_mode<synchronous>, transform_indices = @transform_3, window_bounds = array<i64: 128, 128>}, {pipeline_mode = #tpu.pipeline_mode<synchronous>, transform_indices = @transform_4, window_bounds = array<i64: 1, 128>}, {transform_indices = @transform_5, window_bounds = array<i64: 8, 1>}, {transform_indices = @transform_6, window_bounds = array<i64: 8, 128>}, {transform_indices = @transform_7, window_bounds = array<i64: 1, 1, 128>}]} {
    %c0 = arith.constant 0 : index
    %c0_0 = arith.constant 0 : index
    %0 = vector.load %arg1[%c0, %c0_0] : memref<64x16xf32, #tpu.memory_space<vmem>>, vector<64x16xf32>
    %c0_1 = arith.constant 0 : index
    %c0_2 = arith.constant 0 : index
    %1 = vector.load %arg2[%c0_1, %c0_2] : memref<16x128xf32, #tpu.memory_space<vmem>>, vector<16x128xf32>
    %cst = arith.constant dense<0.000000e+00> : vector<64x128xf32>
    %2 = tpu.matmul %0, %1, %cst {dimension_numbers = #tpu.dot_dimension_numbers<[1], [0], [0], [1], [0, 0, 1, 1], [], []>} : vector<64x16xf32>, vector<16x128xf32>, vector<64x128xf32> -> vector<64x128xf32>
    %c0_3 = arith.constant 0 : index
    %c0_4 = arith.constant 0 : index
    %3 = vector.load %arg3[%c0_3, %c0_4] : memref<1x128xf32, #tpu.memory_space<vmem>>, vector<1x128xf32>
    %4 = vector.broadcast %3 : vector<1x128xf32> to vector<64x128xf32>
    %5 = arith.addf %2, %4 : vector<64x128xf32>
    %6 = math.tanh %5 : vector<64x128xf32>
    %7 = vector.shape_cast %6 : vector<64x128xf32> to vector<8x8x128xf32>
    %cst_5 = arith.constant dense<0.000000e+00> : vector<8x128xf32>
    %8 = vector.multi_reduction <add>, %7, %cst_5 [1] : vector<8x8x128xf32> to vector<8x128xf32>
    %cst_6 = arith.constant 1.250000e-01 : f32
    %9 = vector.broadcast %cst_6 : f32 to vector<8x128xf32>
    %10 = arith.mulf %8, %9 : vector<8x128xf32>
    %c0_7 = arith.constant 0 : index
    %c0_8 = arith.constant 0 : index
    %11 = vector.load %arg4[%c0_7, %c0_8] : memref<128x128xf32, #tpu.memory_space<vmem>>, vector<128x128xf32>
    %cst_9 = arith.constant dense<0.000000e+00> : vector<8x128xf32>
    %12 = tpu.matmul %10, %11, %cst_9 {dimension_numbers = #tpu.dot_dimension_numbers<[1], [0], [0], [1], [0, 0, 1, 1], [], []>} : vector<8x128xf32>, vector<128x128xf32>, vector<8x128xf32> -> vector<8x128xf32>
    %c0_10 = arith.constant 0 : index
    %c0_11 = arith.constant 0 : index
    %13 = vector.load %arg5[%c0_10, %c0_11] : memref<1x128xf32, #tpu.memory_space<vmem>>, vector<1x128xf32>
    %14 = vector.broadcast %13 : vector<1x128xf32> to vector<8x128xf32>
    %15 = arith.addf %12, %14 : vector<8x128xf32>
    %c0_12 = arith.constant 0 : index
    %c0_13 = arith.constant 0 : index
    %16 = vector.load %arg7[%c0_12, %c0_13] : memref<8x128xf32, #tpu.memory_space<vmem>>, vector<8x128xf32>
    tpu.vector_store %arg7[%c0_12, %c0_13], %15 {strides = array<i32>} : memref<8x128xf32, #tpu.memory_space<vmem>>, vector<8x128xf32>,
    %17 = tpu.iota {dimensions = array<i32: 1>} : vector<8x128xi32>
    %c8_i32 = arith.constant 8 : i32
    %18 = vector.broadcast %c8_i32 : i32 to vector<8x128xi32>
    %19 = arith.cmpi slt, %17, %18 : vector<8x128xi32>
    %cst_14 = arith.constant -1.000000e+30 : f32
    %20 = vector.broadcast %cst_14 : f32 to vector<8x128xf32>
    %21 = arith.select %19, %15, %20 : vector<8x128xi1>, vector<8x128xf32>
    %cst_15 = arith.constant dense<0xFF800000> : vector<8xf32>
    %22 = vector.multi_reduction <maximumf>, %21, %cst_15 [1] : vector<8x128xf32> to vector<8xf32>
    %23 = vector.shape_cast %22 : vector<8xf32> to vector<8x1xf32>
    %24 = vector.broadcast %23 : vector<8x1xf32> to vector<8x128xf32>
    %25 = arith.subf %21, %24 : vector<8x128xf32>
    %26 = math.exp %25 : vector<8x128xf32>
    %cst_16 = arith.constant dense<0.000000e+00> : vector<8xf32>
    %27 = vector.multi_reduction <add>, %26, %cst_16 [1] : vector<8x128xf32> to vector<8xf32>
    %28 = vector.shape_cast %27 : vector<8xf32> to vector<8x1xf32>
    %c0_17 = arith.constant 0 : index
    %c0_18 = arith.constant 0 : index
    %29 = vector.load %arg6[%c0_17, %c0_18] : memref<8x1xi32, #tpu.memory_space<vmem>>, vector<8x1xi32>
    %30 = vector.broadcast %29 : vector<8x1xi32> to vector<8x128xi32>
    %31 = arith.cmpi eq, %17, %30 : vector<8x128xi32>
    %cst_19 = arith.constant 0.000000e+00 : f32
    %32 = vector.broadcast %cst_19 : f32 to vector<8x128xf32>
    %33 = arith.select %31, %25, %32 : vector<8x128xi1>, vector<8x128xf32>
    %cst_20 = arith.constant dense<0.000000e+00> : vector<8xf32>
    %34 = vector.multi_reduction <add>, %33, %cst_20 [1] : vector<8x128xf32> to vector<8xf32>
    %35 = vector.shape_cast %34 : vector<8xf32> to vector<8x1xf32>
    %36 = math.log %28 : vector<8x1xf32>
    %37 = arith.subf %36, %35 : vector<8x1xf32>
    %cst_21 = arith.constant 0.000000e+00 : f32
    %38 = vector.broadcast %cst_21 : f32 to vector<1x1x128xf32>
    %39 = vector.shape_cast %37 : vector<8x1xf32> to vector<1x8x1xf32>
    %cst_22 = arith.constant dense<0.000000e+00> : vector<1xf32>
    %40 = vector.multi_reduction <add>, %39, %cst_22 [1, 2] : vector<1x8x1xf32> to vector<1xf32>
    %41 = vector.shape_cast %40 : vector<1xf32> to vector<1x1x1xf32>
    %42 = vector.extract %41[0, 0, 0] : f32 from vector<1x1x1xf32>
    %43 = vector.broadcast %42 : f32 to vector<1x1x128xf32>
    %44 = arith.addf %38, %43 : vector<1x1x128xf32>
    %c0_23 = arith.constant 0 : index
    %c0_24 = arith.constant 0 : index
    %c0_25 = arith.constant 0 : index
    %45 = vector.load %arg8[%c0_23, %c0_24, %c0_25] : memref<1x1x128xf32, #tpu.memory_space<vmem>>, vector<1x1x128xf32>
    tpu.vector_store %arg8[%c0_23, %c0_24, %c0_25], %44 {strides = array<i32>} : memref<1x1x128xf32, #tpu.memory_space<vmem>>, vector<1x1x128xf32>,
    return
  }
  func.func @transform_0(%arg0: i32) -> (i32, i32) {
    %c0_i32 = arith.constant 0 : i32
    %c0_i32_0 = arith.constant 0 : i32
    return %arg0, %c0_i32 : i32, i32
  }
  func.func @transform_1(%arg0: i32) -> (i32, i32) {
    %c0_i32 = arith.constant 0 : i32
    %c0_i32_0 = arith.constant 0 : i32
    %c0_i32_1 = arith.constant 0 : i32
    return %c0_i32, %c0_i32_0 : i32, i32
  }
  func.func @transform_2(%arg0: i32) -> (i32, i32) {
    %c0_i32 = arith.constant 0 : i32
    %c0_i32_0 = arith.constant 0 : i32
    %c0_i32_1 = arith.constant 0 : i32
    return %c0_i32, %c0_i32_0 : i32, i32
  }
  func.func @transform_3(%arg0: i32) -> (i32, i32) {
    %c0_i32 = arith.constant 0 : i32
    %c0_i32_0 = arith.constant 0 : i32
    %c0_i32_1 = arith.constant 0 : i32
    return %c0_i32, %c0_i32_0 : i32, i32
  }
  func.func @transform_4(%arg0: i32) -> (i32, i32) {
    %c0_i32 = arith.constant 0 : i32
    %c0_i32_0 = arith.constant 0 : i32
    %c0_i32_1 = arith.constant 0 : i32
    return %c0_i32, %c0_i32_0 : i32, i32
  }
  func.func @transform_5(%arg0: i32) -> (i32, i32) {
    %c0_i32 = arith.constant 0 : i32
    %c0_i32_0 = arith.constant 0 : i32
    return %arg0, %c0_i32 : i32, i32
  }
  func.func @transform_6(%arg0: i32) -> (i32, i32) {
    %c0_i32 = arith.constant 0 : i32
    %c0_i32_0 = arith.constant 0 : i32
    return %arg0, %c0_i32 : i32, i32
  }
  func.func @transform_7(%arg0: i32) -> (i32, i32, i32) {
    %c0_i32 = arith.constant 0 : i32
    %c0_i32_0 = arith.constant 0 : i32
    %c0_i32_1 = arith.constant 0 : i32
    return %arg0, %c0_i32, %c0_i32_0 : i32, i32, i32
  }
}

</mosaic_0001>

<bundles_post_ra>
// kernel: tpu_custom_call.1
= control target key start
LH: loop header
LB: loop body
LE: loop exit
PB: predicated region body
PF: predicated region fallthrough
CT: control target
= control target key end

     0   :  { %13 = vsyncpa [#allocation3], 0  ;;  %s1348_s0 = inlined_call_operand.vmem [shape: f32[128,16], index: 0, kind: input, shape index: {}]   ;;  %s1349_s1 = inlined_call_operand.vmem [shape: f32[16,128], index: 1, kind: input, shape index: {}]   ;;  %s1350_s2 = inlined_call_operand.vmem [shape: f32[1,128], index: 2, kind: input, shape index: {}]   ;;  %s1351_s3 = inlined_call_operand.vmem [shape: f32[128,128], index: 3, kind: input, shape index: {}]   ;;  %s1352_s4 = inlined_call_operand.vmem [shape: f32[1,128], index: 4, kind: input, shape index: {}]   ;;  %s1353_s5 = inlined_call_operand.vmem [shape: s32[16,1], index: 5, kind: input, shape index: {}]   ;;  %s1354_s6 = inlined_call_operand.hbm [shape: f32[16,128], index: 6, kind: output, shape index: {0}]   ;;  %s1355_s7 = inlined_call_operand.hbm [shape: f32[2,1,128], index: 7, kind: output, shape index: {1}]  }
   0x1   :  { %15 = vsyncpa [#allocation3 + $0x1], 0 }
   0x2   :  { %16 = vsyncpa [#allocation5], 0 }
   0x3   :  { %18 = vsyncpa [#allocation5 + $0x1], 0  ;;  %s1142_s24 = smov 0   ;;  %s1144_s25 = smov 0  }
   0x4   :  { %s1146_s26 = smov 0   ;;  %s1148_s27 = smov 0  }
   0x5 LB: > { %s1163_s28 = sadd.s32 4294967295, %s1094_s27   ;;  %s800_s29 = sadd.s32 4294967294, %s1094_s27   ;;  %s1094_s27 = sphi %s1148_s27, %s1361_s27   ;;  %s1090_s26 = sphi %s1146_s26, %s1360_s26   ;;  %s1086_s25 = sphi %s1144_s25, %s1359_s25   ;;  %s1082_s24 = sphi %s1142_s24, %s1358_s24  }
   0x6   : > { %s1167_s30 = sadd.s32 1, %s1094_s27   ;;  %s167_s8 = sadd.s32 1, %s1090_s26 }
   0x7   : > { %s164_s9 = ssub.s32 %s1094_s27, %s1167_s30  ;;  %p177_p0 = scmp.ne.s32.totalorder %s1090_s26, %s1086_s25 }
   0x8   : > { %p165_p1 = scmp.eq.s32.totalorder %s164_s9, 0  ;;  %p178_p2 = scmp.eq.s32.totalorder %s1163_s28, 1 }
   0x9   : > { %p183_p3 = scmp.ne.s32.totalorder %s1086_s25, %s1082_s24  ;;  %p184_p4 = scmp.eq.s32.totalorder %s800_s29, 1 }
   0xa   : > { %s1178_s10 = scalar_select %p165_p1, %s1090_s26, %s167_s8  }
   0xb   : > { %p1180_p5 = por %p178_p2, %p177_p0  ;;  %p1184_p6 = por %p184_p4, %p183_p3 }
   0xc   : > { %p803_p7 = scmp.ge.s32.totalorder %s1094_s27, 1  ;;  %p256_p8 = scmp.lt.s32.totalorder %s1094_s27, 3 }
   0xe   : > { %p257_p9 = pnand %p803_p7, %p256_p8 }
   0xf   : > { %v314_v0 = vld [vmem:[%s1349_s1] sm:$0xff] (!%p257_p9)  ;;  %v315_v1 = vld [vmem:[%s1349_s1 + $0x8] sm:$0xff] (!%p257_p9)  ;;  %s805_s17 = sshll.u32 (!%p257_p9), %s1163_s28, 3  ;;  %vm323_vm0 = vcmask (!%p257_p9), 130048   ;;  %v1096_v14 = vmov (!%p257_p9), 0.0|0.0   ;;  %v519_v15 = vld [vmem:[%s1351_s3 + $0x10] sm:$0xff] (!%p257_p9) }
  0x10   : > { %260 = sbr.rel (%p257_p9) target bundleno = 1031 (0x407), region = 44  ;;  %v901_v2 = vpack.c.bf16 (!%p257_p9), %v315_v1, %v314_v0  ;;  %p297_p10 = scmp.lt.s32.totalorder (!%p257_p9), %s805_s17, 15  ;;  %v517_v11 = vld [vmem:[%s1351_s3] sm:$0xff] (!%p257_p9)  ;;  %v518_v12 = vld [vmem:[%s1351_s3 + $0x8] sm:$0xff] (!%p257_p9)  ;;  %905 = vmatprep.subr.bf16.mxu1 (!%p257_p9), %v1096_v14  ;;  %v520_v16 = vld [vmem:[%s1351_s3 + $0x18] sm:$0xff] (!%p257_p9)  ;;  %vm1097_vm1 = vmmov (!%p257_p9), 0  }
  0x11   : > { %v906_v13 = vpack.c.bf16 (!%p257_p9), %v518_v12, %v517_v11  ;;  %v909_v17 = vpack.c.bf16 (!%p257_p9), %v520_v16, %v519_v15  ;;  %v521_v18 = vld [vmem:[%s1351_s3 + $0x20] sm:$0xff] (!%p257_p9)  ;;  %v522_v19 = vld [vmem:[%s1351_s3 + $0x28] sm:$0xff] (!%p257_p9)  ;;  %v523_v21 = vld [vmem:[%s1351_s3 + $0x30] sm:$0xff] (!%p257_p9)  ;;  %v1098_v33 = vmov (!%p257_p9), 0.0   ;;  %vm548_vm2 = vcmask (!%p257_p9), 1041409   ;;  %s1261_s14 = sand.u32 (!%p257_p9), 1, %s1086_s25  }
  0x12   : > { %902 = vmatprep.subr.bf16.mxu0 (!%p257_p9), %v901_v2  ;;  %v912_v20 = vpack.c.bf16 (!%p257_p9), %v522_v19, %v521_v18  ;;  %v524_v22 = vld [vmem:[%s1351_s3 + $0x38] sm:$0xff] (!%p257_p9)  ;;  %v525_v24 = vld [vmem:[%s1351_s3 + $0x40] sm:$0xff] (!%p257_p9)  ;;  %v526_v25 = vld [vmem:[%s1351_s3 + $0x48] sm:$0xff] (!%p257_p9)  ;;  %898 = vmatprep.mubr.msk.f32.mxu1 (!%p257_p9), %vm1097_vm1, %v1098_v33  ;;  %vm550_vm3 = vcmask (!%p257_p9), 1042434   ;;  %vm552_vm4 = vcmask (!%p257_p9), 1043459   ;;  %vm554_vm5 = vcmask (!%p257_p9), 1044484  }
  0x13   : > { %904 = vmatpush3.bf16.msra.mxu0 (!%p257_p9), %v901_v2  ;;  %907 = vmatpush3.bf16.msra.mxu1 (!%p257_p9), %v906_v13  ;;  %v915_v23 = vpack.c.bf16 (!%p257_p9), %v524_v22, %v523_v21  ;;  %v918_v26 = vpack.c.bf16 (!%p257_p9), %v526_v25, %v525_v24  ;;  %v527_v27 = vld [vmem:[%s1351_s3 + $0x50] sm:$0xff] (!%p257_p9)  ;;  %v528_v28 = vld [vmem:[%s1351_s3 + $0x58] sm:$0xff] (!%p257_p9)  ;;  %v529_v30 = vld [vmem:[%s1351_s3 + $0x60] sm:$0xff] (!%p257_p9)  ;;  %vm556_vm6 = vcmask (!%p257_p9), 1045509   ;;  %vm558_vm7 = vcmask (!%p257_p9), 1046534   ;;  %s804_s15 = sshll.u32 (!%p257_p9), %s1261_s14, 3 }
  0x14   : > { %908 = vmatprep.subr.bf16.mxu1 (!%p257_p9), %v1096_v14  ;;  %v921_v29 = vpack.c.bf16 (!%p257_p9), %v528_v28, %v527_v27  ;;  %v530_v31 = vld [vmem:[%s1351_s3 + $0x68] sm:$0xff] (!%p257_p9)  ;;  %v531_v34 = vld [vmem:[%s1351_s3 + $0x70] sm:$0xff] (!%p257_p9)  ;;  %v532_v35 = vld [vmem:[%s1351_s3 + $0x78] sm:$0xff] (!%p257_p9)  ;;  %vm560_vm8 = vcmask (!%p257_p9), 1047559   ;;  %p302_p11 = scmp.lt.s32.totalorder (!%p257_p9), %s1163_s28, 1  ;;  %vm656_vm11 = vcmask (!%p257_p9), 7168  }
  0x15   : > { %v924_v32 = vpack.c.bf16 (!%p257_p9), %v530_v31, %v529_v30  ;;  %v927_v36 = vpack.c.bf16 (!%p257_p9), %v532_v35, %v531_v34  ;;  %v808_v37 = vld [vmem:[%s1350_s2] ss:$0 sm:$0xff] (!%p257_p9)  ;;  %s819_s29 = sshll.u32 (!%p257_p9), %s1163_s28, 7  ;;  %s671_s16 = scalar_lea.sflag (!%p257_p9), [#allocation3], %s1261_s14 }
  0x16   : > { %s1279_s13 = scalar_lea.hbm (!%p257_p9), %s1354_s6, %s819_s29 }
  0x17   : > { %s1363_s17 = smov (!%p297_p10, %s805_s17), 15  ;;  %910 = vmatpush3.bf16.msra.mxu1 %v909_v17 }
  0x18   : > { %s806_s18 = sshll.u32 %s1363_s17, 3  ;;  %911 = vmatprep.subr.bf16.mxu1 %v1096_v14 }
  0x19   : > { %s300_s21 = scalar_lea.vmem %s1348_s0, %s806_s18  ;;  %s1267_s18 = scalar_lea.vmem [#allocation2], %s804_s15 }
  0x1a   : > { %v306_v3 = vld [vmem:[%s300_s21] sm:$0xff]  ;;  %v307_v4 = vld [vmem:[%s300_s21 + $0x8] sm:$0xff]  ;;  %v308_v5 = vld [vmem:[%s300_s21 + $0x10] sm:$0xff]  ;;  %s303_s19 = scalar_select %p302_p11, %s1163_s28, 1 }
  0x1b   : > { %854 = vmatprep.mubr.msk.f32.mxu0 %vm323_vm0, %v306_v3  ;;  %v309_v6 = vld [vmem:[%s300_s21 + $0x18] sm:$0xff]  ;;  %v310_v7 = vld [vmem:[%s300_s21 + $0x20] sm:$0xff]  ;;  %v311_v8 = vld [vmem:[%s300_s21 + $0x28] sm:$0xff]  ;;  %913 = vmatpush3.bf16.msra.mxu1 %v912_v20  ;;  %s688_s15 = sshll.u32 %s1267_s18, 4  ;;  %s689_s15 = int_to_ptr.vmem [resolvable:$true] %s688_s15 }
  0x1c   : > { %855 = vmatmul.mubr.msk.f32.vlgmr.msra.gmra.mrb[0].mxu0 %vm323_vm0, %v307_v4  ;;  %v312_v9 = vld [vmem:[%s300_s21 + $0x30] sm:$0xff]  ;;  %v313_v10 = vld [vmem:[%s300_s21 + $0x38] sm:$0xff]  ;;  %914 = vmatprep.subr.bf16.mxu1 %v1096_v14  ;;  %s807_s20 = sshll.u32 %s303_s19, 3  ;;  %s1000_s17 = scalar_lea.vmem %s689_s15, 128 }
  0x1d   : > { %857 = vmatprep.mubr.msk.f32.mxu0 %vm323_vm0, %v308_v5  ;;  %s305_s23 = scalar_lea.vmem %s1353_s5, %s807_s20  ;;  %p1001_p12 = scmp.ne.s32.totalorder %s689_s15, %s1000_s17 }
  0x1e   : > { %s1100_s19 = smov [#allocation2]  }
  0x1f   : > { %916 = vmatpush3.bf16.msra.mxu1 %v915_v23  ;;  %p1002_p13 = pnand %p1001_p12, %p1180_p5  ;;  %s1004_s20 = sshll.u32 %s1100_s19, 4  ;;  %s1005_s20 = int_to_ptr.vmem [resolvable:$false] %s1004_s20 }
  0x20   : > { %858 = vmatmul.mubr.msk.f32.gmra.mrb[2].mxu0 %vm323_vm0, %v309_v6  ;;  %917 = vmatprep.subr.bf16.mxu1 %v1096_v14  ;;  %s1006_s21 = scalar_lea.vmem %s1005_s20, 256  ;;  %p1007_p1 = scmp.lt.s32.totalorder %s689_s15, %s1005_s20 }
  0x21   : > { %860 = vmatprep.mubr.msk.f32.mxu0 %vm323_vm0, %v310_v7  ;;  %p1003_p0 = pneg %p1002_p13  ;;  %p1008_p2 = scmp.lt.s32.totalorder %s1006_s21, %s1000_s17 }
  0x23   : > { %919 = vmatpush3.bf16.msra.mxu1 %v918_v26  ;;  %p1009_p3 = por %p1008_p2, %p1007_p1 }
  0x24   : > { %861 = vmatmul.mubr.msk.f32.gmra.mrb[4].mxu0 %vm323_vm0, %v311_v8  ;;  %920 = vmatprep.subr.bf16.mxu1 %v1096_v14 }
  0x25   : > { %863 = vmatprep.mubr.msk.f32.mxu0 %vm323_vm0, %v312_v9  ;;  %p1010_p4 = pnand %p1009_p3, %p1003_p0 }
  0x27   : > { %922 = vmatpush3.bf16.msra.mxu1 %v921_v29 }
  0x28   : > { %864 = vmatmul.mubr.msk.f32.gmra.mrb[6].mxu0 %vm323_vm0, %v313_v10  ;;  %923 = vmatprep.subr.bf16.mxu1 %v1096_v14 }
  0x2b   : > { %925 = vmatpush3.bf16.msra.mxu1 %v924_v32 }
  0x2c   : > { %926 = vmatprep.subr.bf16.mxu1 %v1096_v14 }
  0x2f   : > { %928 = vmatpush3.bf16.msra.mxu1 %v927_v36 }
  0xef   : > { %v856_v38 = vpop.f32.mrb[0].mxu0 }
  0xf0   : > { %v420_v39 = vadd.f32 %v856_v38, %v808_v37  ;;  %v414_v40 = vpop.f32.mrb[1].mxu0 }
  0xf1   : > { %v415_v41 = vadd.f32 %v808_v37, %v414_v40 }
  0xf2   : > { %980 = vtanh.f32 %v420_v39 }
  0xf3   : > { %982 = vtanh.f32 %v415_v41  ;;  %v859_v42 = vpop.f32.mrb[2].mxu0 }
  0xf4   : > { %v430_v43 = vadd.f32 %v859_v42, %v808_v37  ;;  %v424_v44 = vpop.f32.mrb[3].mxu0 }
  0xf5   : > { %v425_v45 = vadd.f32 %v808_v37, %v424_v44 }
  0xf6   : > { %984 = vtanh.f32 %v430_v43 }
  0xf7   : > { %986 = vtanh.f32 %v425_v45  ;;  %v862_v46 = vpop.f32.mrb[4].mxu0 }
  0xf8   : > { %v440_v47 = vadd.f32 %v862_v46, %v808_v37  ;;  %v434_v48 = vpop.f32.mrb[5].mxu0 }
  0xf9   : > { %v435_v49 = vadd.f32 %v808_v37, %v434_v48 }
  0xfa   : > { %988 = vtanh.f32 %v440_v47 }
  0xfb   : > { %990 = vtanh.f32 %v435_v49  ;;  %v865_v50 = vpop.f32.mrb[6].mxu0 }
  0xfc   : > { %v981_v51 = vpop.eup %980  ;;  %v450_v52 = vadd.f32 %v865_v50, %v808_v37  ;;  %v444_v53 = vpop.f32.mrb[7].mxu0 }
  0xfd   : > { %v983_v54 = vpop.eup %982  ;;  %v467_v55 = vrot.slane %v981_v51, 4  ;;  %v445_v56 = vadd.f32 %v808_v37, %v444_v53 }
  0xfe   : > { %v461_v57 = vrot.slane %v983_v54, 4  ;;  %992 = vtanh.f32 %v450_v52 }
  0xff   : > { %v468_v58 = vadd.f32 %v981_v51, %v467_v55  ;;  %994 = vtanh.f32 %v445_v56 }
 0x100   : > { %v985_v59 = vpop.eup %984  ;;  %v462_v60 = vadd.f32 %v983_v54, %v461_v57 }
 0x101   : > { %v987_v61 = vpop.eup %986  ;;  %v469_v62 = vrot.slane %v468_v58, 2  ;;  %v479_v63 = vrot.slane %v985_v59, 4 }
 0x102   : > { %v463_v0 = vrot.slane %v462_v60, 2  ;;  %v473_v1 = vrot.slane %v987_v61, 4 }
 0x103   : > { %v470_v2 = vadd.f32 %v469_v62, %v468_v58  ;;  %v480_v3 = vadd.f32 %v985_v59, %v479_v63  ;;  %v634_v62 = vlaneseq }
 0x104   : > { %v989_v4 = vpop.eup %988  ;;  %v464_v5 = vadd.f32 %v463_v0, %v462_v60  ;;  %v474_v6 = vadd.f32 %v987_v61, %v473_v1  ;;  %v1099_v61 = vmov 0   ;;  %v817_v0 = vld [vmem:[%s1352_s4] ss:$0 sm:$0xff] }
 0x105   : > { %v991_v7 = vpop.eup %990  ;;  %v471_v8 = vrot.slane %v470_v2, 1  ;;  %v481_v9 = vrot.slane %v480_v3, 2  ;;  %v491_v10 = vrot.slane %v989_v4, 4  ;;  %979 = vset.pattern.permute.xlu0 %v1099_v61  ;;  %v635_v63 = vand.u32 127, %v634_v62 }
 0x106   : > { %v465_v11 = vrot.slane %v464_v5, 1  ;;  %v475_v12 = vrot.slane %v474_v6, 2  ;;  %v485_v13 = vrot.slane %v991_v7, 4 }
 0x107   : > { %v472_v14 = vadd.f32 %v471_v8, %v470_v2  ;;  %v482_v15 = vadd.f32 %v481_v9, %v480_v3  ;;  %v492_v16 = vadd.f32 %v989_v4, %v491_v10  ;;  %vm636_vm9 = vcmp.lt.s32.totalorder %v635_v63, 8 }
 0x108   : > { %v993_v17 = vpop.eup %992  ;;  %v466_v18 = vadd.f32 %v465_v11, %v464_v5  ;;  %v476_v19 = vadd.f32 %v475_v12, %v474_v6  ;;  %v486_v20 = vadd.f32 %v991_v7, %v485_v13  ;;  %v645_v5 = vld [vmem:[%s305_s23] sm:$0xff] }
 0x109   : > { %v995_v21 = vpop.eup %994  ;;  %v510_v22 = vmul.f32 0.125, %v472_v14  ;;  %v483_v23 = vrot.slane %v482_v15, 1  ;;  %v493_v24 = vrot.slane %v492_v16, 2  ;;  %v503_v25 = vrot.slane %v993_v17, 4 }
 0x10a   : > { %v509_v26 = vmul.f32 0.125, %v466_v18  ;;  %v477_v27 = vrot.slane %v476_v19, 1  ;;  %v487_v28 = vrot.slane %v486_v20, 2  ;;  %v497_v29 = vrot.slane %v995_v21, 4 }
 0x10b   : > { %v484_v30 = vadd.f32 %v483_v23, %v482_v15  ;;  %v494_v31 = vadd.f32 %v493_v24, %v492_v16  ;;  %v504_v32 = vadd.f32 %v993_v17, %v503_v25 }
 0x10c   : > { %v478_v33 = vadd.f32 %v477_v27, %v476_v19  ;;  %v488_v34 = vadd.f32 %v487_v28, %v486_v20  ;;  %v498_v35 = vadd.f32 %v995_v21, %v497_v29  ;;  %v549_v36 = vsel %vm548_vm2, %v510_v22, %v509_v26 }
 0x10d   : > { %v495_v37 = vrot.slane %v494_v31, 1  ;;  %v505_v38 = vrot.slane %v504_v32, 2  ;;  %v512_v44 = vmul.f32 0.125, %v484_v30 }
 0x10e   : > { %v511_v39 = vmul.f32 0.125, %v478_v33  ;;  %v489_v40 = vrot.slane %v488_v34, 1  ;;  %v499_v41 = vrot.slane %v498_v35, 2 }
 0x10f   : > { %v496_v42 = vadd.f32 %v495_v37, %v494_v31  ;;  %v506_v43 = vadd.f32 %v505_v38, %v504_v32 }
 0x110   : > { %v490_v45 = vadd.f32 %v489_v40, %v488_v34  ;;  %v500_v46 = vadd.f32 %v499_v41, %v498_v35  ;;  %v551_v47 = vsel %vm550_vm3, %v511_v39, %v549_v36 }
 0x111   : > { %v507_v48 = vrot.slane %v506_v43, 1  ;;  %v553_v49 = vsel %vm552_vm4, %v512_v44, %v551_v47  ;;  %v514_v53 = vmul.f32 0.125, %v496_v42 }
 0x112   : > { %v501_v50 = vrot.slane %v500_v46, 1  ;;  %v513_v51 = vmul.f32 0.125, %v490_v45 }
 0x113   : > { %v508_v52 = vadd.f32 %v507_v48, %v506_v43 }
 0x114   : > { %v502_v54 = vadd.f32 %v501_v50, %v500_v46  ;;  %v555_v55 = vsel %vm554_vm5, %v513_v51, %v553_v49 }
 0x115   : > { %v557_v56 = vsel %vm556_vm6, %v514_v53, %v555_v55  ;;  %v516_v58 = vmul.f32 0.125, %v508_v52 }
 0x116   : > { %v515_v57 = vmul.f32 0.125, %v502_v54 }
 0x118   : > { %v559_v59 = vsel %vm558_vm7, %v515_v57, %v557_v56 }
 0x119   : > { %v561_v60 = vsel %vm560_vm8, %v516_v58, %v559_v59 }
 0x11a   : > { %899 = vmatmul.mubr.f32.vlgmr.msra.gmra.mrb[0].mxu1 %v561_v60 }
 0x1ed   : > { %v629_v1 = vpop.f32.mrb[0].mxu1 }
 0x1ee   : > { %v630_v2 = vadd.f32 %v817_v0, %v629_v1  ;;  %v900_v3 = vpop.f32.mrb[1].mxu1 }
 0x1f0   : > { %633 = vst [vmem:[%s1267_s18] sm:$0xff] %v630_v2  ;;  %v637_v4 = vsel %vm636_vm9, %v630_v2, -1e+30 }
 0x1f1   : > { %638 = vmax.xlane.f32.xlu0 %v637_v4 }
 0x207   : > { %647 = vperm.xlu0 %979, %v645_v5  }
 0x27e   : > { %v639_v6 = vpop.xlane.xlu0 %638 }
 0x27f   : > { %v640_v7 = vsub.f32 %v637_v4, %v639_v6 }
 0x281   : > { %v641_v8 = vmul.f32 1.442695, %v640_v7 }
 0x283   : > { %996 = vpow2.f32 %v641_v8 }
 0x286   : > { %v648_v9 = vpop.permute.xlu0 %647 }
 0x287   : > { %vm649_vm10 = vcmp.eq.s32.totalorder %v635_v63, %v648_v9 }
 0x288   : > { %v650_v11 = vsel %vm649_vm10, %v640_v7, 0.0 }
 0x28d   : > { %v997_v10 = vpop.eup %996 }
 0x28e   : > { %643 = vadd.xlane.f32.xlu1 %v997_v10 }
 0x292   : > { %651 = vadd.xlane.f32.xlu1 %v650_v11 }
 0x31b   : > { %v644_v12 = vpop.xlane.xlu1 %643 }
 0x31c   : > { %998 = vlog2.f32 %v644_v12 }
 0x31f   : > { %v652_v15 = vpop.xlane.xlu1 %651 }
 0x326   : > { %v999_v13 = vpop.eup %998 }
 0x327   : > { %v654_v14 = vmul.f32 0.6931472, %v999_v13 }
 0x329   : > { %v655_v16 = vsub.f32 %v654_v14, %v652_v15 }
 0x32b   : > { %v657_v17 = vsel %vm656_vm11, %v655_v16, 0.0 }
 0x32c   : > { %658 = vadd.xlane.f32.xlu1 %v657_v17 }
 0x32d   : > { %1013 = shalt.err (!%p1010_p4)
}
 0x32e   : > { %s1014_s18 = scalar_lea.hbm %s1279_s13, 128  ;;  %s1018_s29 = scalar_lea.hbm %s1354_s6, 256 }
 0x32f   : > { %p1015_p7 = scmp.ne.s32.totalorder %s1279_s13, %s1014_s18  ;;  %p1019_p10 = scmp.lt.u32.totalorder %s1279_s13, %s1354_s6 }
 0x330   : > { %p1020_p11 = scmp.lt.u32.totalorder %s1018_s29, %s1014_s18  ;;  %p1022_p13 = scmp.lt.u32.totalorder %s1014_s18, %s1279_s13 }
 0x331   : > { %p1016_p8 = pnand %p1015_p7, %p1180_p5 }
 0x332   : > { %p1021_p12 = por %p1020_p11, %p1019_p10 }
 0x333   : > { %p1017_p9 = pneg %p1016_p8 }
 0x334   : > { %p1023_p0 = por %p1022_p13, %p1021_p12 }
 0x336   : > { %p1024_p1 = pnand %p1023_p0, %p1017_p9 }
 0x338   : > { %1027 = shalt.err (!%p1024_p1)
}
 0x339   : > { %931 = dma.vmem_to_hbm [thread:$0]  (%p1180_p5), %s689_s15, 128, %s1279_s13, %s671_s16  }
 0x33a   : > { %s295_s17 = scalar_lea.vmem [#allocation4], %s1261_s14  ;;  %s820_s20 = sshll.u32 %s1163_s28, 4 }
 0x33b   : > { %s701_s19 = sshll.u32 %s295_s17, 4  ;;  %s1307_s16 = scalar_lea.hbm %s1355_s7, %s820_s20  ;;  %s1302_s19 = int_to_ptr.vmem [resolvable:$true] %s701_s19 }
 0x33c   : > { %s676_s18 = scalar_lea.sflag [#allocation5], %s1261_s14  ;;  %s1028_s22 = scalar_lea.vmem %s1302_s19, 16 }
 0x33d   : > { %p1029_p2 = scmp.ne.s32.totalorder %s1302_s19, %s1028_s22  ;;  %s1101_s28 = smov [#allocation4]  }
 0x33e   : > { %s1032_s23 = sshll.u32 %s1101_s28, 4  ;;  %s1033_s23 = int_to_ptr.vmem [resolvable:$false] %s1032_s23 }
 0x33f   : > { %p1030_p3 = pnand %p1029_p2, %p1180_p5  ;;  %s1034_s29 = scalar_lea.vmem %s1033_s23, 32 }
 0x340   : > { %p1035_p7 = scmp.lt.s32.totalorder %s1302_s19, %s1033_s23  ;;  %p1036_p8 = scmp.lt.s32.totalorder %s1034_s29, %s1028_s22 }
 0x341   : > { %p1031_p4 = pneg %p1030_p3 }
 0x342   : > { %p1037_p9 = por %p1036_p8, %p1035_p7 }
 0x344   : > { %p1038_p10 = pnand %p1037_p9, %p1031_p4 }
 0x3b9   : > { %v659_v18 = vpop.xlane.xlu1 %658 }
 0x3ba   : > { %v660_v19 = vrot.slane %v659_v18, 4 }
 0x3bc   : > { %v661_v20 = vadd.f32 %v660_v19, %v659_v18 }
 0x3be   : > { %v662_v21 = vrot.slane %v661_v20, 2 }
 0x3c0   : > { %v663_v22 = vadd.f32 %v662_v21, %v661_v20 }
 0x3c2   : > { %v664_v23 = vrot.slane %v663_v22, 1 }
 0x3c4   : > { %v665_v24 = vadd.f32 %v664_v23, %v663_v22 }
 0x3c6   : > { %929 = vpush %v665_v24 }
 0x3f7   : > { %s930_s21 = spop %929 }
 0x3f8   : > { %v667_v25 = vstv %s930_s21 }
 0x3f9   : > { %669 = vst [vmem:[%s295_s17] sm:$0x1] %v667_v25 }
 0x3fa   : > { %1041 = shalt.err (!%p1038_p10)
}
 0x3fb   : > { %s1042_s14 = scalar_lea.hbm %s1307_s16, 16  ;;  %s1046_s17 = scalar_lea.hbm %s1355_s7, 32 }
 0x3fc   : > { %p1043_p11 = scmp.ne.s32.totalorder %s1307_s16, %s1042_s14  ;;  %p1047_p0 = scmp.lt.u32.totalorder %s1307_s16, %s1355_s7 }
 0x3fd   : > { %p1048_p1 = scmp.lt.u32.totalorder %s1046_s17, %s1042_s14  ;;  %p1050_p3 = scmp.lt.u32.totalorder %s1042_s14, %s1307_s16 }
 0x3fe   : > { %p1044_p12 = pnand %p1043_p11, %p1180_p5 }
 0x3ff   : > { %p1049_p2 = por %p1048_p1, %p1047_p0 }
 0x400   : > { %p1045_p13 = pneg %p1044_p12 }
 0x401   : > { %p1051_p4 = por %p1050_p3, %p1049_p2 }
 0x403   : > { %p1052_p7 = pnand %p1051_p4, %p1045_p13 }
 0x405   : > { %1055 = shalt.err (!%p1052_p7)
}
 0x406   : > { %932 = dma.vmem_to_hbm [thread:$0]  (%p1180_p5), %s1302_s19, 16, %s1307_s16, %s676_s18  }
 0x407 PF: > { %p942_p8 = scmp.ge.s32.totalorder %s1094_s27, 2  ;;  %s713_s13 = sand.u32 1, %s1082_s24  }
 0x408   : > { %s714_s15 = scalar_lea.sflag [#allocation3], %s713_s13 }
 0x409   : > { %p936_p9 = pnand %p942_p8, %p1184_p6 }
 0x40b   : > { %1073 = dma.done.wait (!%p936_p9), %s714_s15, 128  }
 0x40c   : > { %1075 = vsyncadd (!%p936_p9), %s714_s15, 4294967168  ;;  %s723_s22 = scalar_lea.sflag [#allocation5], %s713_s13 }
 0x40d   : > { %1077 = dma.done.wait (!%p936_p9), %s723_s22, 16  }
 0x40e   : > { %1079 = vsyncadd (!%p936_p9), %s723_s22, 4294967280  ;;  %p21_p5 = scmp.ge.s32.totalorder %s1167_s30, 4   ;;  %s1358_s24 = smov %s1086_s25 }
 0x40f   : > { %s1359_s25 = smov %s1090_s26  ;;  %s1360_s26 = smov %s1178_s10 }
 0x410   : > { %s1361_s27 = smov %s1167_s30  ;;  %23 = sbr.rel (!%p21_p5) target bundleno = 5 (0x5), region = 99 }
 0x417   :  { %727 = vsyncpa [#allocation3], 1 }
 0x418   :  { %729 = vsyncpa [#allocation3 + $0x1], 1 }
 0x419   :  { %730 = vsyncpa [#allocation5], 1 }
 0x41a   :  { %732 = vsyncpa [#allocation5 + $0x1], 1 }

</bundles_post_ra>
